<compile_context>
chip_gen: v7x
topology: tpu7x:2x2x1
jax: 0.10.0
libtpu: 0.0.40
codegen_flags: <defaults>
</compile_context>

<pallas_src>
import jax
import jax.numpy as jnp
from jax import lax
from jax.experimental import pallas as pl
from jax.experimental.pallas import tpu as pltpu


def _round_up(v, m):
    return ((v + m - 1) // m) * m


# ----------------------------- Pallas kernel -------------------------------

def fused_conv_pool_head_kernel(x_ref, w1_ref, b1_ref, pool_ref, w2_ref,
                                b2_ref, o_ref):
    """Fused conv(3x3, same) + bias + ReLU + GAP + linear head for B images.

    x_ref    : [B*rows_img, 9*Cin]  bf16 im2col patches (tap-major, ch-minor)
    w1_ref   : [9*Cin, CPAD]        bf16 conv weights (lane-padded)
    b1_ref   : [1, CPAD]            f32 conv bias (zero-padded lanes)
    pool_ref : [B, B*rows_img]      f32 block-diag 1/(H*W) pool matrix
                                    (zeros on per-image row padding)
    w2_ref   : [CPAD, NPAD]         f32 head weights (zero-padded)
    b2_ref   : [1, NPAD]            f32 head bias (zero-padded)
    o_ref    : [1, B, NPAD]         f32 logits (lane-dense, padded)
    """
    # 3x3 conv as ONE im2col matmul on the MXU (bf16 operands, f32 accum).
    conv = jnp.dot(x_ref[...], w1_ref[...],
                   preferred_element_type=jnp.float32)        # [B*rows, CPAD]
    conv = jnp.maximum(conv + b1_ref[...], 0.0)

    # Global average pool per image as a block-diagonal MXU matmul.
    pooled = jnp.dot(pool_ref[...], conv,
                     preferred_element_type=jnp.float32)      # [B, CPAD]

    logits = jnp.dot(pooled, w2_ref[...],
                     preferred_element_type=jnp.float32) + b2_ref[...]
    o_ref[...] = logits[None, :, :]                           # [1, B, NPAD]


# ------------------------------ JAX wrapper --------------------------------

def wrapped_model_forward(x, params, *, batch_tile=None):
    """WrappedModel(model).forward(x): passthrough to the inner CNN.

    x: [N, Cin, H, W] float32 (NCHW, PyTorch convention).
    params: (w1 [Cout,Cin,3,3], b1 [Cout], w2 [n_cls,Cout], b2 [n_cls]).
    """
    N, C, H, W = x.shape
    w1, b1, w2, b2 = params
    cout = w1.shape[0]
    n_cls = w2.shape[0]

    hw = H * W
    rows_img = _round_up(hw, 8)          # per-image rows, sublane aligned
    cpad = _round_up(cout, 128)          # lane-dense conv-channel dim
    npad = _round_up(n_cls, 128)         # lane-dense logits dim

    # Images per grid step: amortize per-step overhead but keep >= 2 grid
    # steps when N >= 2 so v7x's two TensorCores both get work.
    if batch_tile is None:
        batch_tile = 1 if N <= 1 else min(8, max(1, N // 2))
    n_steps = -(-N // batch_tile)
    n_pad = n_steps * batch_tile

    # ---- im2col (tap-major, channel-minor; matches w1 flattening below) ---
    x_nhwc = jnp.transpose(x, (0, 2, 3, 1)).astype(jnp.float32)
    x_sp = jnp.pad(x_nhwc, ((0, 0), (1, 1), (1, 1), (0, 0)))   # 'same' pad
    patches = [x_sp[:, dh:dh + H, dw:dw + W, :]
               for dh in range(3) for dw in range(3)]
    x_col = jnp.concatenate(patches, axis=-1).reshape(N, hw, 9 * C)
    x_col = jnp.pad(x_col, ((0, n_pad - N), (0, rows_img - hw), (0, 0)))
    x_col = x_col.reshape(n_pad * rows_img, 9 * C).astype(jnp.bfloat16)

    # Conv weight [Cout, Cin, 3, 3] -> [9*Cin, cpad] (tap-major, ch-minor).
    w1_mat = jnp.transpose(w1, (2, 3, 1, 0)).reshape(9 * C, cout)
    w1_mat = jnp.pad(w1_mat, ((0, 0), (0, cpad - cout))).astype(jnp.bfloat16)
    b1_row = jnp.pad(b1.reshape(1, cout),
                     ((0, 0), (0, cpad - cout))).astype(jnp.float32)

    # Block-diagonal pool matrix: 1/(H*W) on valid rows, 0 on row padding.
    base = jnp.where(jnp.arange(rows_img) < hw, 1.0 / hw, 0.0)
    pool_mat = jnp.kron(jnp.eye(batch_tile, dtype=jnp.float32),
                        base.reshape(1, rows_img).astype(jnp.float32))

    # Head [n_cls, Cout] -> [cpad, npad] (zero-padded), f32 (tiny).
    w2_mat = jnp.pad(w2.T, ((0, cpad - cout),
                            (0, npad - n_cls))).astype(jnp.float32)
    b2_row = jnp.pad(b2.reshape(1, n_cls),
                     ((0, 0), (0, npad - n_cls))).astype(jnp.float32)

    # Advisory cost with TRUE (unpadded) dims.
    flops = int(2 * N * hw * (9 * C) * cout     # conv matmul
                + 4 * N * hw * cout             # bias + relu + pool
                + 2 * N * cout * n_cls)         # head
    bytes_accessed = int(2 * x_col.size + 2 * w1_mat.size
                         + 4 * (b1_row.size + pool_mat.size
                                + w2_mat.size + b2_row.size)
                         + 4 * n_pad * npad)

    out = pl.pallas_call(
        fused_conv_pool_head_kernel,
        out_shape=jax.ShapeDtypeStruct((n_steps, batch_tile, npad),
                                       jnp.float32),
        grid=(n_steps,),
        in_specs=[
            pl.BlockSpec((batch_tile * rows_img, 9 * C), lambda i: (i, 0)),
            pl.BlockSpec((9 * C, cpad), lambda i: (0, 0)),
            pl.BlockSpec((1, cpad), lambda i: (0, 0)),
            pl.BlockSpec((batch_tile, batch_tile * rows_img),
                         lambda i: (0, 0)),
            pl.BlockSpec((cpad, npad), lambda i: (0, 0)),
            pl.BlockSpec((1, npad), lambda i: (0, 0)),
        ],
        out_specs=pl.BlockSpec((1, batch_tile, npad), lambda i: (i, 0, 0)),
        compiler_params=pltpu.CompilerParams(
            dimension_semantics=("parallel",),
            vmem_limit_bytes=32 * 1024 * 1024,
        ),
        cost_estimate=pl.CostEstimate(
            flops=flops, transcendentals=0, bytes_accessed=bytes_accessed),
    )(x_col, w1_mat, b1_row, pool_mat, w2_mat, b2_row)

    return out.reshape(n_pad, npad)[:N, :n_cls]


# ------------------------------ Reference ----------------------------------

def _reference_forward(x, params):
    w1, b1, w2, b2 = params
    conv = lax.conv_general_dilated(
        x, w1, window_strides=(1, 1), padding=((1, 1), (1, 1)),
        dimension_numbers=("NCHW", "OIHW", "NCHW"))
    conv = jnp.maximum(conv + b1[None, :, None, None], 0.0)
    pooled = jnp.mean(conv, axis=(2, 3))
    return pooled @ w2.T + b2[None, :]


def make_params(key, cin=4, cout=8, n_cls=10):
    k1, k2, k3, k4 = jax.random.split(key, 4)
    w1 = jax.random.normal(k1, (cout, cin, 3, 3), jnp.float32) * 0.1
    b1 = jax.random.normal(k2, (cout,), jnp.float32) * 0.1
    w2 = jax.random.normal(k3, (n_cls, cout), jnp.float32) * 0.1
    b2 = jax.random.normal(k4, (n_cls,), jnp.float32) * 0.1
    return (w1, b1, w2, b2)


if __name__ == "__main__":
    key = jax.random.PRNGKey(0)
    kx, kp = jax.random.split(key)
    x = jax.random.normal(kx, (2, 4, 16, 16), jnp.float32)   # NCHW
    params = make_params(kp)

    out = jax.jit(wrapped_model_forward)(x, params)
    jax.block_until_ready(out)
    assert out.shape == (2, 10) and out.dtype == jnp.float32

    ref = _reference_forward(x, params)
    max_err = float(jnp.max(jnp.abs(out - ref)))
    assert jnp.allclose(out, ref, atol=2e-3, rtol=2e-3), max_err

    print("KERNEL_OK")
</pallas_src>

<mosaic_0001>
module attributes {stable_mosaic.version = 11 : i64} {
  func.func @fused_conv_pool_head_kernel(%arg0: i32, %arg1: memref<256x36xbf16, #tpu.memory_space<vmem>>, %arg2: memref<36x128xbf16, #tpu.memory_space<vmem>>, %arg3: memref<1x128xf32, #tpu.memory_space<vmem>>, %arg4: memref<1x256xf32, #tpu.memory_space<vmem>>, %arg5: memref<128x128xf32, #tpu.memory_space<vmem>>, %arg6: memref<1x128xf32, #tpu.memory_space<vmem>>, %arg7: memref<1x1x128xf32, #tpu.memory_space<vmem>>) attributes {dimension_semantics = [#tpu.dimension_semantics<parallel>], iteration_bounds = array<i64: 2>, scalar_prefetch = 0 : i64, scratch_operands = 0 : i64, tpu.core_type = #tpu.core_type<tc>, window_params = [{transform_indices = @transform_0, window_bounds = array<i64: 256, 36>}, {pipeline_mode = #tpu.pipeline_mode<synchronous>, transform_indices = @transform_1, window_bounds = array<i64: 36, 128>}, {pipeline_mode = #tpu.pipeline_mode<synchronous>, transform_indices = @transform_2, window_bounds = array<i64: 1, 128>}, {pipeline_mode = #tpu.pipeline_mode<synchronous>, transform_indices = @transform_3, window_bounds = array<i64: 1, 256>}, {pipeline_mode = #tpu.pipeline_mode<synchronous>, transform_indices = @transform_4, window_bounds = array<i64: 128, 128>}, {pipeline_mode = #tpu.pipeline_mode<synchronous>, transform_indices = @transform_5, window_bounds = array<i64: 1, 128>}, {transform_indices = @transform_6, window_bounds = array<i64: 1, 1, 128>}]} {
    %c0 = arith.constant 0 : index
    %c0_0 = arith.constant 0 : index
    %0 = vector.load %arg1[%c0, %c0_0] : memref<256x36xbf16, #tpu.memory_space<vmem>>, vector<256x36xbf16>
    %c0_1 = arith.constant 0 : index
    %c0_2 = arith.constant 0 : index
    %1 = vector.load %arg2[%c0_1, %c0_2] : memref<36x128xbf16, #tpu.memory_space<vmem>>, vector<36x128xbf16>
    %cst = arith.constant dense<0.000000e+00> : vector<256x128xf32>
    %2 = tpu.matmul %0, %1, %cst {dimension_numbers = #tpu.dot_dimension_numbers<[1], [0], [0], [1], [0, 0, 1, 1], [], []>} : vector<256x36xbf16>, vector<36x128xbf16>, vector<256x128xf32> -> vector<256x128xf32>
    %c0_3 = arith.constant 0 : index
    %c0_4 = arith.constant 0 : index
    %3 = vector.load %arg3[%c0_3, %c0_4] : memref<1x128xf32, #tpu.memory_space<vmem>>, vector<1x128xf32>
    %4 = vector.broadcast %3 : vector<1x128xf32> to vector<256x128xf32>
    %5 = arith.addf %2, %4 : vector<256x128xf32>
    %cst_5 = arith.constant 0.000000e+00 : f32
    %6 = vector.broadcast %cst_5 : f32 to vector<256x128xf32>
    %7 = arith.maximumf %5, %6 : vector<256x128xf32>
    %c0_6 = arith.constant 0 : index
    %c0_7 = arith.constant 0 : index
    %8 = vector.load %arg4[%c0_6, %c0_7] : memref<1x256xf32, #tpu.memory_space<vmem>>, vector<1x256xf32>
    %cst_8 = arith.constant dense<0.000000e+00> : vector<1x128xf32>
    %9 = tpu.matmul %8, %7, %cst_8 {dimension_numbers = #tpu.dot_dimension_numbers<[1], [0], [0], [1], [0, 0, 1, 1], [], []>} : vector<1x256xf32>, vector<256x128xf32>, vector<1x128xf32> -> vector<1x128xf32>
    %c0_9 = arith.constant 0 : index
    %c0_10 = arith.constant 0 : index
    %10 = vector.load %arg5[%c0_9, %c0_10] : memref<128x128xf32, #tpu.memory_space<vmem>>, vector<128x128xf32>
    %cst_11 = arith.constant dense<0.000000e+00> : vector<1x128xf32>
    %11 = tpu.matmul %9, %10, %cst_11 {dimension_numbers = #tpu.dot_dimension_numbers<[1], [0], [0], [1], [0, 0, 1, 1], [], []>} : vector<1x128xf32>, vector<128x128xf32>, vector<1x128xf32> -> vector<1x128xf32>
    %c0_12 = arith.constant 0 : index
    %c0_13 = arith.constant 0 : index
    %12 = vector.load %arg6[%c0_12, %c0_13] : memref<1x128xf32, #tpu.memory_space<vmem>>, vector<1x128xf32>
    %13 = arith.addf %11, %12 : vector<1x128xf32>
    %14 = vector.shape_cast %13 : vector<1x128xf32> to vector<1x1x128xf32>
    %c0_14 = arith.constant 0 : index
    %c0_15 = arith.constant 0 : index
    %c0_16 = arith.constant 0 : index
    %15 = vector.load %arg7[%c0_14, %c0_15, %c0_16] : memref<1x1x128xf32, #tpu.memory_space<vmem>>, vector<1x1x128xf32>
    tpu.vector_store %arg7[%c0_14, %c0_15, %c0_16], %14 {strides = array<i32>} : memref<1x1x128xf32, #tpu.memory_space<vmem>>, vector<1x1x128xf32>,
    return
  }
  func.func @transform_0(%arg0: i32) -> (i32, i32) {
    %c0_i32 = arith.constant 0 : i32
    %c0_i32_0 = arith.constant 0 : i32
    return %arg0, %c0_i32 : i32, i32
  }
  func.func @transform_1(%arg0: i32) -> (i32, i32) {
    %c0_i32 = arith.constant 0 : i32
    %c0_i32_0 = arith.constant 0 : i32
    %c0_i32_1 = arith.constant 0 : i32
    return %c0_i32, %c0_i32_0 : i32, i32
  }
  func.func @transform_2(%arg0: i32) -> (i32, i32) {
    %c0_i32 = arith.constant 0 : i32
    %c0_i32_0 = arith.constant 0 : i32
    %c0_i32_1 = arith.constant 0 : i32
    return %c0_i32, %c0_i32_0 : i32, i32
  }
  func.func @transform_3(%arg0: i32) -> (i32, i32) {
    %c0_i32 = arith.constant 0 : i32
    %c0_i32_0 = arith.constant 0 : i32
    %c0_i32_1 = arith.constant 0 : i32
    return %c0_i32, %c0_i32_0 : i32, i32
  }
  func.func @transform_4(%arg0: i32) -> (i32, i32) {
    %c0_i32 = arith.constant 0 : i32
    %c0_i32_0 = arith.constant 0 : i32
    %c0_i32_1 = arith.constant 0 : i32
    return %c0_i32, %c0_i32_0 : i32, i32
  }
  func.func @transform_5(%arg0: i32) -> (i32, i32) {
    %c0_i32 = arith.constant 0 : i32
    %c0_i32_0 = arith.constant 0 : i32
    %c0_i32_1 = arith.constant 0 : i32
    return %c0_i32, %c0_i32_0 : i32, i32
  }
  func.func @transform_6(%arg0: i32) -> (i32, i32, i32) {
    %c0_i32 = arith.constant 0 : i32
    %c0_i32_0 = arith.constant 0 : i32
    %c0_i32_1 = arith.constant 0 : i32
    return %arg0, %c0_i32, %c0_i32_0 : i32, i32, i32
  }
}

</mosaic_0001>

<bundles_post_ra>
// kernel: wrapped_model_forward.1
= control target key start
LH: loop header
LB: loop body
LE: loop exit
PB: predicated region body
PF: predicated region fallthrough
CT: control target
= control target key end

     0   :  { %11 = vsyncpa [#allocation3], 0  ;;  %s1545_s0 = inlined_call_operand.vmem [shape: bf16[512,36], index: 0, kind: input, shape index: {}]   ;;  %s1546_s1 = inlined_call_operand.vmem [shape: bf16[36,128], index: 1, kind: input, shape index: {}]   ;;  %s1547_s2 = inlined_call_operand.vmem [shape: f32[1,128], index: 2, kind: input, shape index: {}]   ;;  %s1548_s3 = inlined_call_operand.vmem [shape: f32[1,256], index: 3, kind: input, shape index: {}]   ;;  %s1549_s4 = inlined_call_operand.vmem [shape: f32[128,128], index: 4, kind: input, shape index: {}]   ;;  %s1550_s5 = inlined_call_operand.vmem [shape: f32[1,128], index: 5, kind: input, shape index: {}]   ;;  %s1551_s6 = inlined_call_operand.hbm [shape: f32[2,1,128], index: 6, kind: output, shape index: {}]  }
   0x1   :  { %13 = vsyncpa [#allocation3 + $0x1], 0  ;;  %s1285_s21 = smov 0   ;;  %s1287_s22 = smov 0  }
   0x2   :  { %s1289_s23 = smov 0   ;;  %s1291_s24 = smov 0  }
   0x3 LB: > { %s1306_s25 = sadd.s32 4294967295, %s1244_s24   ;;  %s875_s26 = sadd.s32 4294967294, %s1244_s24   ;;  %s1244_s24 = sphi %s1291_s24, %s1557_s24   ;;  %s1240_s23 = sphi %s1289_s23, %s1556_s23   ;;  %s1236_s22 = sphi %s1287_s22, %s1555_s22   ;;  %s1232_s21 = sphi %s1285_s21, %s1554_s21  }
   0x4   : > { %s1310_s27 = sadd.s32 1, %s1244_s24   ;;  %s157_s28 = sadd.s32 1, %s1240_s23 }
   0x5   : > { %s154_s29 = ssub.s32 %s1244_s24, %s1310_s27  ;;  %p167_p0 = scmp.ne.s32.totalorder %s1240_s23, %s1236_s22 }
   0x6   : > { %p155_p1 = scmp.eq.s32.totalorder %s154_s29, 0  ;;  %p168_p2 = scmp.eq.s32.totalorder %s1306_s25, 1 }
   0x7   : > { %p173_p3 = scmp.ne.s32.totalorder %s1236_s22, %s1232_s21  ;;  %p174_p4 = scmp.eq.s32.totalorder %s875_s26, 1 }
   0x8   : > { %s1321_s30 = scalar_select %p155_p1, %s1240_s23, %s157_s28  }
   0x9   : > { %p1323_p5 = por %p168_p2, %p167_p0  ;;  %p1327_p6 = por %p174_p4, %p173_p3 }
   0xa   : > { %p878_p7 = scmp.ge.s32.totalorder %s1244_s24, 1  ;;  %p216_p8 = scmp.lt.s32.totalorder %s1244_s24, 3 }
   0xc   : > { %p217_p9 = pnand %p878_p7, %p216_p8 }
   0xd   : > { %v1163_v0 = vld [vmem:[%s1546_s1] sm:$0xff] (!%p217_p9)   ;;  %v1164_v1 = vld [vmem:[%s1546_s1 + $0x8] sm:$0xff] (!%p217_p9)   ;;  %s879_s13 = sshll.u32 (!%p217_p9), %s1306_s25, 5  ;;  %v1165_v2 = vld [vmem:[%s1546_s1 + $0x10] ss:$0 sps:$4 sm:$0x33] (!%p217_p9)   ;;  %v639_v20 = vlaneseq (!%p217_p9) }
   0xe   : > { %220 = sbr.rel (%p217_p9) target bundleno = 754 (0x2f2), region = 44  ;;  %991 = vmatprep.subr.bf16.mxu0 (!%p217_p9), %v1163_v0  ;;  %p246_p10 = scmp.lt.s32.totalorder (!%p217_p9), %s879_s13, 63  ;;  %vm440_vm0 = vcmask (!%p217_p9), 1041408   ;;  %vm391_vm1 = vcmask (!%p217_p9), 293888   ;;  %v637_v23 = vld [vmem:[%s1548_s3] sm:$0x3] (!%p217_p9) }
   0xf   : > { %992 = vmatpush3.bf16.msra.mxu0 (!%p217_p9), %v1163_v0  ;;  %v442_v3 = vsel (!%p217_p9), %vm440_vm0, %v1165_v2, 0  ;;  %v640_v21 = vshrl.u32 (!%p217_p9), %v639_v20, 7  ;;  %v1388_v27 = vld [vmem:[%s1547_s2] ss:$0 sm:$0xff] (!%p217_p9)  ;;  %vm1247_vm2 = vmmov (!%p217_p9), 0   ;;  %s243_s11 = sand.u32 (!%p217_p9), 1, %s1236_s22  }
  0x10   : > { %993 = vmatprep.subr.bf16.mxu0 (!%p217_p9), %v1164_v1  ;;  %s917_s14 = sshll.u32 (!%p217_p9), %s1306_s25, 4  ;;  %s244_s15 = scalar_lea.vmem (!%p217_p9), [#allocation2], %s243_s11 }
  0x11   : > { %v645_v22 = vsub.s32 (!%p217_p9), 1, %v640_v21  ;;  %v641_v24 = vsub.s32 (!%p217_p9), 0, %v640_v21  ;;  %s808_s20 = scalar_lea.sflag (!%p217_p9), [#allocation3], %s243_s11  ;;  %s1249_s25 = smov (!%p217_p9), [#allocation2]  }
  0x12   : > { %s1186_s28 = sshll.u32 (!%p217_p9), %s1249_s25, 4  ;;  %s1187_s28 = int_to_ptr.vmem [resolvable:$false] %s1186_s28 }
  0x13   : > { %994 = vmatpush3.bf16.msra.mxu0 (!%p217_p9), %v1164_v1  ;;  %v646_v25 = vrot.slane (!%p217_p9), %v637_v23, %v645_v22  ;;  %v1383_v26 = vrot.slane (!%p217_p9), %v637_v23, %v641_v24  ;;  %s1188_s29 = scalar_lea.vmem (!%p217_p9), %s1187_s28, 32 }
  0x14   : > { %1120 = vmatprep.subr.msk.bf16.mxu0 (!%p217_p9), %vm440_vm0, %v1165_v2 }
  0x15   : > { %s1559_s13 = smov (!%p246_p10, %s879_s13), 63  ;;  %713 = vmatprep.mubr.f32.mxu1 %v646_v25 }
  0x16   : > { %s880_s16 = sshll.u32 %s1559_s13, 2 }
  0x17   : > { %s1346_s19 = scalar_lea.vmem %s1545_s0, %s880_s16  ;;  %996 = vmatpush3.bf16.msra.mxu0 %v442_v3  ;;  %s820_s16 = sshll.u32 %s244_s15, 4  ;;  %s1505_s16 = int_to_ptr.vmem [resolvable:$true] %s820_s16 }
  0x18   : > { %v1166_v4 = vld [vmem:[%s1346_s19] sm:$0xff]   ;;  %v1167_v5 = vld [vmem:[%s1346_s19 + $0x8] sm:$0xff]   ;;  %v1168_v6 = vld [vmem:[%s1346_s19 + $0x10] sm:$0xff]   ;;  %s1182_s26 = scalar_lea.vmem %s1505_s16, 16  ;;  %p1189_p0 = scmp.lt.s32.totalorder %s1505_s16, %s1187_s28 }
  0x19   : > { %997 = vmatprep.mubr.msk.bf16.mxu0 %vm391_vm1, %v1166_v4  ;;  %v1169_v7 = vld [vmem:[%s1346_s19 + $0x18] sm:$0xff]   ;;  %v1170_v8 = vld [vmem:[%s1346_s19 + $0x20] sm:$0xff]   ;;  %v1171_v9 = vld [vmem:[%s1346_s19 + $0x28] sm:$0xff]   ;;  %p1183_p11 = scmp.ne.s32.totalorder %s1505_s16, %s1182_s26  ;;  %p1190_p1 = scmp.lt.s32.totalorder %s1188_s29, %s1182_s26 }
  0x1a   : > { %998 = vmatmul.mubr.msk.bf16.vlgmr.msra.gmra.mrb[0].mxu0 %vm391_vm1, %v1167_v5  ;;  %v1172_v10 = vld [vmem:[%s1346_s19 + $0x30] sm:$0xff]   ;;  %v1173_v11 = vld [vmem:[%s1346_s19 + $0x38] sm:$0xff]   ;;  %v1174_v12 = vld [vmem:[%s1346_s19 + $0x40] sm:$0xff]  }
  0x1b   : > { %1001 = vmatprep.mubr.msk.bf16.mxu0 %vm391_vm1, %v1168_v6  ;;  %v1175_v13 = vld [vmem:[%s1346_s19 + $0x48] sm:$0xff]   ;;  %v1176_v14 = vld [vmem:[%s1346_s19 + $0x50] sm:$0xff]   ;;  %v1177_v15 = vld [vmem:[%s1346_s19 + $0x58] sm:$0xff]   ;;  %p1184_p12 = pnand %p1183_p11, %p1323_p5  ;;  %p1191_p2 = por %p1190_p1, %p1189_p0 }
  0x1c   : > { %v1178_v16 = vld [vmem:[%s1346_s19 + $0x60] sm:$0xff]   ;;  %v1179_v17 = vld [vmem:[%s1346_s19 + $0x68] sm:$0xff]   ;;  %v1180_v18 = vld [vmem:[%s1346_s19 + $0x70] sm:$0xff]  }
  0x1d   : > { %v1181_v19 = vld [vmem:[%s1346_s19 + $0x78] sm:$0xff]   ;;  %s1503_s19 = scalar_lea.hbm %s1551_s6, %s917_s14  ;;  %p1185_p13 = pneg %p1184_p12 }
  0x1f   : > { %p1192_p3 = pnand %p1191_p2, %p1185_p13 }
  0x22   : > { %1002 = vmatmul.mubr.msk.bf16.gmra.mrb[4].mxu0 %vm391_vm1, %v1169_v7 }
  0x23   : > { %1005 = vmatprep.mubr.msk.bf16.mxu0 %vm391_vm1, %v1170_v8 }
  0x2a   : > { %1006 = vmatmul.mubr.msk.bf16.gmra.mrb[8].mxu0 %vm391_vm1, %v1171_v9 }
  0x2b   : > { %1009 = vmatprep.mubr.msk.bf16.mxu0 %vm391_vm1, %v1172_v10 }
  0x32   : > { %1010 = vmatmul.mubr.msk.bf16.gmra.mrb[12].mxu0 %vm391_vm1, %v1173_v11 }
  0x33   : > { %1013 = vmatprep.mubr.msk.bf16.mxu0 %vm391_vm1, %v1174_v12 }
  0x3a   : > { %1014 = vmatmul.mubr.msk.bf16.gmra.mrb[16].mxu0 %vm391_vm1, %v1175_v13 }
  0x3b   : > { %1017 = vmatprep.mubr.msk.bf16.mxu0 %vm391_vm1, %v1176_v14 }
  0x42   : > { %1018 = vmatmul.mubr.msk.bf16.gmra.mrb[20].mxu0 %vm391_vm1, %v1177_v15 }
  0x43   : > { %1021 = vmatprep.mubr.msk.bf16.mxu0 %vm391_vm1, %v1178_v16 }
  0x4a   : > { %1022 = vmatmul.mubr.msk.bf16.gmra.mrb[24].mxu0 %vm391_vm1, %v1179_v17 }
  0x4b   : > { %1025 = vmatprep.mubr.msk.bf16.mxu0 %vm391_vm1, %v1180_v18 }
  0x52   : > { %1026 = vmatmul.mubr.msk.bf16.gmra.mrb[28].mxu0 %vm391_vm1, %v1181_v19 }
  0xed   : > { %v999_v28 = vpop.f32.mrb[0].mxu0 }
  0xee   : > { %v487_v29 = vadd.f32 %v999_v28, %v1388_v27  ;;  %v478_v30 = vpop.f32.mrb[1].mxu0 }
  0xef   : > { %v479_v31 = vadd.f32 %v1388_v27, %v478_v30  ;;  %v1000_v32 = vpop.f32.mrb[2].mxu0 }
  0xf0   : > { %v490_v33 = vadd.f32 %v1000_v32, %v1388_v27  ;;  %v481_v34 = vpop.f32.mrb[3].mxu0  ;;  %v607_v36 = vmax.f32 %v487_v29, 0.0 }
  0xf1   : > { %v482_v35 = vadd.f32 %v1388_v27, %v481_v34  ;;  %v605_v38 = vmax.f32 %v479_v31, 0.0 }
  0xf2   : > { %v608_v37 = vmax.f32 %v490_v33, 0.0 }
  0xf3   : > { %v606_v39 = vmax.f32 %v482_v35, 0.0 }
  0xf4   : > { %v1394_v40 = vpack.c.bf16 %v608_v37, %v607_v36 }
  0xf5   : > { %v1003_v41 = vpop.f32.mrb[4].mxu0  ;;  %v1396_v42 = vpack.c.bf16 %v606_v39, %v605_v38 }
  0xf6   : > { %v503_v43 = vadd.f32 %v1003_v41, %v1388_v27  ;;  %v494_v44 = vpop.f32.mrb[5].mxu0 }
  0xf7   : > { %v495_v45 = vadd.f32 %v1388_v27, %v494_v44  ;;  %v1004_v46 = vpop.f32.mrb[6].mxu0 }
  0xf8   : > { %v506_v47 = vadd.f32 %v1004_v46, %v1388_v27  ;;  %v497_v48 = vpop.f32.mrb[7].mxu0  ;;  %v611_v50 = vmax.f32 %v503_v43, 0.0 }
  0xf9   : > { %v498_v49 = vadd.f32 %v1388_v27, %v497_v48  ;;  %v609_v52 = vmax.f32 %v495_v45, 0.0 }
  0xfa   : > { %v612_v51 = vmax.f32 %v506_v47, 0.0 }
  0xfb   : > { %v610_v53 = vmax.f32 %v498_v49, 0.0 }
  0xfc   : > { %v1402_v54 = vpack.c.bf16 %v612_v51, %v611_v50 }
  0xfd   : > { %v1404_v55 = vpack.c.bf16 %v610_v53, %v609_v52  ;;  %v1007_v56 = vpop.f32.mrb[8].mxu0 }
  0xfe   : > { %v519_v57 = vadd.f32 %v1007_v56, %v1388_v27  ;;  %v510_v58 = vpop.f32.mrb[9].mxu0 }
  0xff   : > { %v511_v59 = vadd.f32 %v1388_v27, %v510_v58  ;;  %v1008_v60 = vpop.f32.mrb[10].mxu0 }
 0x100   : > { %v522_v61 = vadd.f32 %v1008_v60, %v1388_v27  ;;  %v513_v62 = vpop.f32.mrb[11].mxu0  ;;  %v615_v0 = vmax.f32 %v519_v57, 0.0 }
 0x101   : > { %v514_v63 = vadd.f32 %v1388_v27, %v513_v62  ;;  %v613_v2 = vmax.f32 %v511_v59, 0.0 }
 0x102   : > { %v616_v1 = vmax.f32 %v522_v61, 0.0 }
 0x103   : > { %v614_v3 = vmax.f32 %v514_v63, 0.0 }
 0x104   : > { %v1410_v4 = vpack.c.bf16 %v616_v1, %v615_v0 }
 0x105   : > { %v1412_v5 = vpack.c.bf16 %v614_v3, %v613_v2  ;;  %v1011_v6 = vpop.f32.mrb[12].mxu0 }
 0x106   : > { %v535_v7 = vadd.f32 %v1011_v6, %v1388_v27  ;;  %v526_v8 = vpop.f32.mrb[13].mxu0 }
 0x107   : > { %v527_v9 = vadd.f32 %v1388_v27, %v526_v8  ;;  %v1012_v10 = vpop.f32.mrb[14].mxu0 }
 0x108   : > { %v538_v11 = vadd.f32 %v1012_v10, %v1388_v27  ;;  %v529_v12 = vpop.f32.mrb[15].mxu0  ;;  %v619_v14 = vmax.f32 %v535_v7, 0.0 }
 0x109   : > { %v530_v13 = vadd.f32 %v1388_v27, %v529_v12  ;;  %v617_v16 = vmax.f32 %v527_v9, 0.0 }
 0x10a   : > { %v620_v15 = vmax.f32 %v538_v11, 0.0 }
 0x10b   : > { %v618_v17 = vmax.f32 %v530_v13, 0.0 }
 0x10c   : > { %v1418_v18 = vpack.c.bf16 %v620_v15, %v619_v14 }
 0x10d   : > { %v1420_v19 = vpack.c.bf16 %v618_v17, %v617_v16  ;;  %v1015_v20 = vpop.f32.mrb[16].mxu0  ;;  %v719_v16 = vld [vmem:[%s1549_s4] sm:$0xff]  ;;  %v1246_v17 = vmov 0.0|0.0  }
 0x10e   : > { %v551_v21 = vadd.f32 %v1015_v20, %v1388_v27  ;;  %v542_v22 = vpop.f32.mrb[17].mxu0 }
 0x10f   : > { %v543_v23 = vadd.f32 %v1388_v27, %v542_v22  ;;  %v1016_v24 = vpop.f32.mrb[18].mxu0 }
 0x110   : > { %v554_v25 = vadd.f32 %v1016_v24, %v1388_v27  ;;  %v545_v28 = vpop.f32.mrb[19].mxu0  ;;  %v623_v30 = vmax.f32 %v551_v21, 0.0  ;;  %v724_v21 = vld [vmem:[%s1549_s4 + $0x28] sm:$0xff] }
 0x111   : > { %v546_v29 = vadd.f32 %v1388_v27, %v545_v28  ;;  %v621_v32 = vmax.f32 %v543_v23, 0.0  ;;  %v725_v23 = vld [vmem:[%s1549_s4 + $0x30] sm:$0xff]  ;;  %v728_v28 = vld [vmem:[%s1549_s4 + $0x48] sm:$0xff] }
 0x112   : > { %v624_v31 = vmax.f32 %v554_v25, 0.0  ;;  %v727_v25 = vld [vmem:[%s1549_s4 + $0x40] sm:$0xff] }
 0x113   : > { %v622_v33 = vmax.f32 %v546_v29, 0.0  ;;  %v1109_v29 = vpack.c.bf16 %v728_v28, %v727_v25 }
 0x114   : > { %v1068_v34 = vpack.c.bf16 %v624_v31, %v623_v30  ;;  %v729_v30 = vld [vmem:[%s1549_s4 + $0x50] sm:$0xff]  ;;  %v730_v31 = vld [vmem:[%s1549_s4 + $0x58] sm:$0xff] }
 0x115   : > { %v1019_v35 = vpop.f32.mrb[20].mxu0  ;;  %v1064_v36 = vpack.c.bf16 %v622_v33, %v621_v32  ;;  %v1112_v32 = vpack.c.bf16 %v730_v31, %v729_v30  ;;  %v731_v33 = vld [vmem:[%s1549_s4 + $0x60] sm:$0xff] }
 0x116   : > { %v567_v37 = vadd.f32 %v1019_v35, %v1388_v27  ;;  %v558_v38 = vpop.f32.mrb[21].mxu0 }
 0x117   : > { %v559_v39 = vadd.f32 %v1388_v27, %v558_v38  ;;  %v1020_v41 = vpop.f32.mrb[22].mxu0  ;;  %1065 = vmatprep.subr.bf16.mxu1 %v1064_v36  ;;  %v733_v36 = vld [vmem:[%s1549_s4 + $0x70] sm:$0xff] }
 0x118   : > { %v570_v43 = vadd.f32 %v1020_v41, %v1388_v27  ;;  %v561_v44 = vpop.f32.mrb[23].mxu0  ;;  %1067 = vmatpush3.bf16.msra.mxu1 %v1396_v42  ;;  %v627_v46 = vmax.f32 %v567_v37, 0.0  ;;  %v734_v37 = vld [vmem:[%s1549_s4 + $0x78] sm:$0xff] }
 0x119   : > { %v562_v45 = vadd.f32 %v1388_v27, %v561_v44  ;;  %1069 = vmatprep.subr.bf16.mxu1 %v1068_v34  ;;  %v625_v48 = vmax.f32 %v559_v39, 0.0  ;;  %v732_v34 = vld [vmem:[%s1549_s4 + $0x68] sm:$0xff]  ;;  %v1118_v38 = vpack.c.bf16 %v734_v37, %v733_v36  ;;  %v1248_v39 = vmov 0.0  }
 0x11a   : > { %v628_v47 = vmax.f32 %v570_v43, 0.0  ;;  %v1115_v35 = vpack.c.bf16 %v732_v34, %v731_v33 }
 0x11b   : > { %v626_v49 = vmax.f32 %v562_v45, 0.0  ;;  %v735_v45 = vld [vmem:[%s1550_s5] sm:$0x1] }
 0x11c   : > { %v1076_v50 = vpack.c.bf16 %v628_v47, %v627_v46  ;;  %1071 = vmatpush3.bf16.msra.mxu1 %v1394_v40 }
 0x11d   : > { %v1072_v51 = vpack.c.bf16 %v626_v49, %v625_v48  ;;  %v1023_v52 = vpop.f32.mrb[24].mxu0 }
 0x11e   : > { %v583_v53 = vadd.f32 %v1023_v52, %v1388_v27  ;;  %v574_v56 = vpop.f32.mrb[25].mxu0 }
 0x11f   : > { %v575_v57 = vadd.f32 %v1388_v27, %v574_v56  ;;  %v1024_v58 = vpop.f32.mrb[26].mxu0  ;;  %1073 = vmatprep.subr.bf16.mxu1 %v1072_v51 }
 0x120   : > { %v586_v42 = vadd.f32 %v1024_v58, %v1388_v27  ;;  %v577_v59 = vpop.f32.mrb[27].mxu0  ;;  %1075 = vmatpush3.bf16.msra.mxu1 %v1404_v55  ;;  %v631_v61 = vmax.f32 %v583_v53, 0.0 }
 0x121   : > { %v578_v60 = vadd.f32 %v1388_v27, %v577_v59  ;;  %1077 = vmatprep.subr.bf16.mxu1 %v1076_v50  ;;  %v629_v40 = vmax.f32 %v575_v57, 0.0 }
 0x122   : > { %v632_v62 = vmax.f32 %v586_v42, 0.0 }
 0x123   : > { %v630_v63 = vmax.f32 %v578_v60, 0.0 }
 0x124   : > { %v1084_v0 = vpack.c.bf16 %v632_v62, %v631_v61  ;;  %1079 = vmatpush3.bf16.msra.mxu1 %v1402_v54 }
 0x125   : > { %v1080_v1 = vpack.c.bf16 %v630_v63, %v629_v40  ;;  %v1027_v2 = vpop.f32.mrb[28].mxu0 }
 0x126   : > { %v599_v3 = vadd.f32 %v1027_v2, %v1388_v27  ;;  %v590_v6 = vpop.f32.mrb[29].mxu0 }
 0x127   : > { %v591_v7 = vadd.f32 %v1388_v27, %v590_v6  ;;  %v1028_v8 = vpop.f32.mrb[30].mxu0  ;;  %1081 = vmatprep.subr.bf16.mxu1 %v1080_v1 }
 0x128   : > { %v602_v55 = vadd.f32 %v1028_v8, %v1388_v27  ;;  %v593_v9 = vpop.f32.mrb[31].mxu0  ;;  %1083 = vmatpush3.bf16.msra.mxu1 %v1412_v5  ;;  %v635_v11 = vmax.f32 %v599_v3, 0.0 }
 0x129   : > { %v594_v10 = vadd.f32 %v1388_v27, %v593_v9  ;;  %1085 = vmatprep.subr.bf16.mxu1 %v1084_v0  ;;  %v633_v54 = vmax.f32 %v591_v7, 0.0  ;;  %v720_v27 = vld [vmem:[%s1549_s4 + $0x8] sm:$0xff] }
 0x12a   : > { %v636_v12 = vmax.f32 %v602_v55, 0.0  ;;  %v1097_v5 = vpack.c.bf16 %v720_v27, %v719_v16 }
 0x12b   : > { %v634_v13 = vmax.f32 %v594_v10, 0.0 }
 0x12c   : > { %v1092_v14 = vpack.c.bf16 %v636_v12, %v635_v11  ;;  %1087 = vmatpush3.bf16.msra.mxu1 %v1410_v4  ;;  %v721_v4 = vld [vmem:[%s1549_s4 + $0x10] sm:$0xff] }
 0x12d   : > { %v1088_v15 = vpack.c.bf16 %v634_v13, %v633_v54 }
 0x12f   : > { %1089 = vmatprep.subr.bf16.mxu1 %v1088_v15 }
 0x130   : > { %1091 = vmatpush3.bf16.msra.mxu1 %v1420_v19  ;;  %v722_v19 = vld [vmem:[%s1549_s4 + $0x18] sm:$0xff] }
 0x131   : > { %1093 = vmatprep.subr.bf16.mxu1 %v1092_v14  ;;  %v1100_v20 = vpack.c.bf16 %v722_v19, %v721_v4 }
 0x134   : > { %1095 = vmatpush3.bf16.msra.mxu1 %v1418_v18  ;;  %v723_v18 = vld [vmem:[%s1549_s4 + $0x20] sm:$0xff] }
 0x135   : > { %1096 = vmatprep.subr.bf16.mxu1 %v1246_v17  ;;  %v1103_v22 = vpack.c.bf16 %v724_v21, %v723_v18 }
 0x137   : > { %714 = vmatmul.mubr.f32.vlgmr.msra.gmra.mrb[0].mxu1 %v1383_v26  ;;  %v726_v26 = vld [vmem:[%s1549_s4 + $0x38] sm:$0xff] }
 0x138   : > { %1098 = vmatpush3.bf16.msra.mxu1 %v1097_v5  ;;  %v1106_v24 = vpack.c.bf16 %v726_v26, %v725_v23  ;;  %1061 = vmatprep.mubr.msk.f32.mxu1 %vm1247_vm2, %v1248_v39 }
 0x139   : > { %1099 = vmatprep.subr.bf16.mxu1 %v1246_v17 }
 0x13c   : > { %1101 = vmatpush3.bf16.msra.mxu1 %v1100_v20 }
 0x13d   : > { %1102 = vmatprep.subr.bf16.mxu1 %v1246_v17 }
 0x140   : > { %1104 = vmatpush3.bf16.msra.mxu1 %v1103_v22 }
 0x141   : > { %1105 = vmatprep.subr.bf16.mxu1 %v1246_v17 }
 0x144   : > { %1107 = vmatpush3.bf16.msra.mxu1 %v1106_v24 }
 0x145   : > { %1108 = vmatprep.subr.bf16.mxu1 %v1246_v17 }
 0x148   : > { %1110 = vmatpush3.bf16.msra.mxu1 %v1109_v29 }
 0x149   : > { %1111 = vmatprep.subr.bf16.mxu1 %v1246_v17 }
 0x14c   : > { %1113 = vmatpush3.bf16.msra.mxu1 %v1112_v32 }
 0x14d   : > { %1114 = vmatprep.subr.bf16.mxu1 %v1246_v17 }
 0x150   : > { %1116 = vmatpush3.bf16.msra.mxu1 %v1115_v35 }
 0x151   : > { %1117 = vmatprep.subr.bf16.mxu1 %v1246_v17 }
 0x154   : > { %1119 = vmatpush3.bf16.msra.mxu1 %v1118_v38 }
 0x20a   : > { %v971_v41 = vpop.f32.mrb[0].mxu1 }
 0x20b   : > { %v972_v43 = vpop.f32.mrb[1].mxu1 }
 0x20c   : > { %v973_v44 = vadd.f32 %v972_v43, %v971_v41 }
 0x20e   : > { %1062 = vmatmul.mubr.f32.vlgmr.msra.gmra.mrb[2].mxu1 %v973_v44 }
 0x2e1   : > { %v802_v46 = vpop.f32.mrb[2].mxu1 }
 0x2e2   : > { %v803_v47 = vadd.f32 %v802_v46, %v735_v45  ;;  %v1063_v48 = vpop.f32.mrb[3].mxu1 }
 0x2e4   : > { %806 = vst [vmem:[%s244_s15] sm:$0x1] %v803_v47 }
 0x2e5   : > { %1195 = shalt.err (!%p1192_p3)
}
 0x2e6   : > { %s1196_s9 = scalar_lea.hbm %s1503_s19, 16  ;;  %s1200_s12 = scalar_lea.hbm %s1551_s6, 32 }
 0x2e7   : > { %p1197_p4 = scmp.ne.s32.totalorder %s1503_s19, %s1196_s9  ;;  %p1201_p9 = scmp.lt.u32.totalorder %s1503_s19, %s1551_s6 }
 0x2e8   : > { %p1202_p10 = scmp.lt.u32.totalorder %s1200_s12, %s1196_s9  ;;  %p1204_p12 = scmp.lt.u32.totalorder %s1196_s9, %s1503_s19 }
 0x2e9   : > { %p1198_p7 = pnand %p1197_p4, %p1323_p5 }
 0x2ea   : > { %p1203_p11 = por %p1202_p10, %p1201_p9 }
 0x2eb   : > { %p1199_p8 = pneg %p1198_p7 }
 0x2ec   : > { %p1205_p13 = por %p1204_p12, %p1203_p11 }
 0x2ee   : > { %p1206_p0 = pnand %p1205_p13, %p1199_p8 }
 0x2f0   : > { %1209 = shalt.err (!%p1206_p0)
}
 0x2f1   : > { %1121 = dma.vmem_to_hbm [thread:$0]  (%p1323_p5), %s1505_s16, 16, %s1503_s19, %s808_s20  }
 0x2f2 PF: > { %p1127_p1 = scmp.ge.s32.totalorder %s1244_s24, 2  ;;  %s832_s15 = sand.u32 1, %s1232_s21  }
 0x2f3   : > { %s833_s17 = scalar_lea.sflag [#allocation3], %s832_s15 }
 0x2f4   : > { %p1124_p2 = pnand %p1127_p1, %p1327_p6 }
 0x2f6   : > { %1227 = dma.done.wait (!%p1124_p2), %s833_s17, 16  }
 0x2f7   : > { %1229 = vsyncadd (!%p1124_p2), %s833_s17, 4294967280  ;;  %p16_p3 = scmp.ge.s32.totalorder %s1310_s27, 4   ;;  %s1554_s21 = smov %s1236_s22 }
 0x2f8   : > { %s1555_s22 = smov %s1240_s23  ;;  %s1556_s23 = smov %s1321_s30 }
 0x2f9   : > { %s1557_s24 = smov %s1310_s27  ;;  %18 = sbr.rel (!%p16_p3) target bundleno = 3 (0x3), region = 79 }
 0x300   :  { %837 = vsyncpa [#allocation3], 1 }
 0x301   :  { %839 = vsyncpa [#allocation3 + $0x1], 1 }

</bundles_post_ra>
